<compile_context>
chip_gen: v7x
topology: tpu7x:2x2x1
jax: 0.10.0
libtpu: 0.0.40
codegen_flags: <defaults>
</compile_context>

<pallas_src>
import jax
import jax.numpy as jnp
from jax.experimental import pallas as pl
from jax.experimental.pallas import tpu as pltpu


def _round_up(n, m):
    return ((n + m - 1) // m) * m


def _mlp_kernel(x_ref, w1_ref, b1_ref, w2_ref, b2_ref, o_ref):
    # hidden = relu(x @ W1 + b1)   (f32 accumulate on the MXU)
    h = jnp.dot(x_ref[...], w1_ref[...], preferred_element_type=jnp.float32)
    h = jnp.maximum(h + b1_ref[...], 0.0)
    # out = hidden @ W2 + b2  (cast hidden back to the weight dtype so bf16
    # weights still hit the bf16 MXU path; no-op for f32 params)
    out = jnp.dot(h.astype(w2_ref.dtype), w2_ref[...],
                  preferred_element_type=jnp.float32)
    o_ref[...] = (out + b2_ref[...]).astype(o_ref.dtype)


def embedding_forward(x, params, *, tm_max=512):
    """Shared embedding MLP: relu(x @ W1 + b1) @ W2 + b2, as one Pallas call."""
    w1, b1, w2, b2 = params
    batch, d_in = x.shape
    hidden = w1.shape[1]
    d_out = w2.shape[1]

    # --- lane-dense output: pad the output feature dim to a multiple of 128
    #     (zero columns in W2/b2), slice the padding off outside the kernel.
    d_out_pad = _round_up(d_out, 128)
    if d_out_pad != d_out:
        w2 = jnp.pad(w2, ((0, 0), (0, d_out_pad - d_out)))
        b2 = jnp.pad(b2, ((0, 0), (0, d_out_pad - d_out)))

    # --- batch tiling: stream activation tiles, keep weights VMEM-resident.
    tm = min(tm_max, _round_up(batch, 8))
    b_pad = _round_up(batch, tm)
    if b_pad != batch:
        x = jnp.pad(x, ((0, b_pad - batch), (0, 0)))
    grid = (b_pad // tm,)

    # --- explicit VMEM budget so the same tile choice stays inside v7x's
    #     64 MiB VMEM: double-buffered x/out tiles + resident weights +
    #     f32 intermediates, with headroom.
    itm = x.dtype.itemsize
    act_bytes = 2 * tm * d_in * itm + 2 * tm * d_out_pad * itm
    wgt_bytes = (d_in * hidden + hidden + hidden * d_out_pad + d_out_pad) * w1.dtype.itemsize
    inter_bytes = 2 * tm * max(hidden, d_out_pad) * 4
    vmem_limit = act_bytes + wgt_bytes + inter_bytes + (8 << 20)
    vmem_limit = int(min(max(vmem_limit, 16 << 20), 48 << 20))

    out = pl.pallas_call(
        _mlp_kernel,
        out_shape=jax.ShapeDtypeStruct((b_pad, d_out_pad), x.dtype),
        grid=grid,
        in_specs=[
            pl.BlockSpec((tm, d_in), lambda i: (i, 0)),        # activations: streamed
            pl.BlockSpec(w1.shape, lambda i: (0, 0)),          # weights: VMEM-resident
            pl.BlockSpec(b1.shape, lambda i: (0, 0)),
            pl.BlockSpec(w2.shape, lambda i: (0, 0)),
            pl.BlockSpec(b2.shape, lambda i: (0, 0)),
        ],
        out_specs=pl.BlockSpec((tm, d_out_pad), lambda i: (i, 0)),
        compiler_params=pltpu.CompilerParams(
            dimension_semantics=("parallel",),                 # 2 TCs on v7x
            vmem_limit_bytes=vmem_limit,
        ),
    )(x, w1, b1, w2, b2)

    return out[:batch, :d_out]


def simclr_forward(x1, x2, params):
    """SimCLRNet.forward: one shared embedding over the concatenated views."""
    representations = jnp.concatenate([x1, x2], axis=0)   # (2B, D_in)
    return embedding_forward(representations, params)     # (2B, D_out)


def get_embedding(x, params):
    """SimCLRNet.get_embedding."""
    return embedding_forward(x, params)


def init_params(key, d_in, hidden, d_out, dtype=jnp.float32):
    k1, k2, k3, k4 = jax.random.split(key, 4)
    # Deterministic, roughly Kaiming-scaled init.
    w1 = jax.random.normal(k1, (d_in, hidden), dtype) * (2.0 / d_in) ** 0.5
    b1 = jax.random.normal(k2, (1, hidden), dtype) * 0.01
    w2 = jax.random.normal(k3, (hidden, d_out), dtype) * (2.0 / hidden) ** 0.5
    b2 = jax.random.normal(k4, (1, d_out), dtype) * 0.01
    return (w1, b1, w2, b2)


def _reference(x1, x2, params):
    w1, b1, w2, b2 = params
    x = jnp.concatenate([x1, x2], axis=0)
    return jnp.maximum(x @ w1 + b1, 0.0) @ w2 + b2


if __name__ == "__main__":
    B, D_IN, HIDDEN, D_OUT = 8, 64, 128, 32

    key = jax.random.PRNGKey(0)
    kx1, kx2, kp = jax.random.split(key, 3)
    x1 = jax.random.normal(kx1, (B, D_IN), jnp.float32)
    x2 = jax.random.normal(kx2, (B, D_IN), jnp.float32)
    params = init_params(kp, D_IN, HIDDEN, D_OUT)

    out = jax.jit(simclr_forward)(x1, x2, params)
    jax.block_until_ready(out)

    # Correctness check against a pure-JAX reference of the same math.
    ref = _reference(x1, x2, params)
    assert out.shape == (2 * B, D_OUT)
    assert jnp.allclose(out, ref, atol=1e-4, rtol=1e-4)

    # get_embedding path (single view) also goes through the same kernel.
    emb = jax.jit(get_embedding)(x1, params)
    jax.block_until_ready(emb)
    assert emb.shape == (B, D_OUT)
    assert jnp.allclose(emb, ref[:B], atol=1e-4, rtol=1e-4)

    print("KERNEL_OK")
</pallas_src>

<mosaic_0001>
module attributes {stable_mosaic.version = 11 : i64} {
  func.func @_mlp_kernel(%arg0: i32, %arg1: memref<16x64xf32, #tpu.memory_space<vmem>>, %arg2: memref<64x128xf32, #tpu.memory_space<vmem>>, %arg3: memref<1x128xf32, #tpu.memory_space<vmem>>, %arg4: memref<128x128xf32, #tpu.memory_space<vmem>>, %arg5: memref<1x128xf32, #tpu.memory_space<vmem>>, %arg6: memref<16x128xf32, #tpu.memory_space<vmem>>) attributes {dimension_semantics = [#tpu.dimension_semantics<parallel>], iteration_bounds = array<i64: 1>, scalar_prefetch = 0 : i64, scratch_operands = 0 : i64, tpu.core_type = #tpu.core_type<tc>, window_params = [{transform_indices = @transform_0, window_bounds = array<i64: 16, 64>}, {pipeline_mode = #tpu.pipeline_mode<synchronous>, transform_indices = @transform_1, window_bounds = array<i64: 64, 128>}, {pipeline_mode = #tpu.pipeline_mode<synchronous>, transform_indices = @transform_2, window_bounds = array<i64: 1, 128>}, {pipeline_mode = #tpu.pipeline_mode<synchronous>, transform_indices = @transform_3, window_bounds = array<i64: 128, 128>}, {pipeline_mode = #tpu.pipeline_mode<synchronous>, transform_indices = @transform_4, window_bounds = array<i64: 1, 128>}, {transform_indices = @transform_5, window_bounds = array<i64: 16, 128>}]} {
    %c0 = arith.constant 0 : index
    %c0_0 = arith.constant 0 : index
    %0 = vector.load %arg1[%c0, %c0_0] : memref<16x64xf32, #tpu.memory_space<vmem>>, vector<16x64xf32>
    %c0_1 = arith.constant 0 : index
    %c0_2 = arith.constant 0 : index
    %1 = vector.load %arg2[%c0_1, %c0_2] : memref<64x128xf32, #tpu.memory_space<vmem>>, vector<64x128xf32>
    %cst = arith.constant dense<0.000000e+00> : vector<16x128xf32>
    %2 = tpu.matmul %0, %1, %cst {dimension_numbers = #tpu.dot_dimension_numbers<[1], [0], [0], [1], [0, 0, 1, 1], [], []>} : vector<16x64xf32>, vector<64x128xf32>, vector<16x128xf32> -> vector<16x128xf32>
    %c0_3 = arith.constant 0 : index
    %c0_4 = arith.constant 0 : index
    %3 = vector.load %arg3[%c0_3, %c0_4] : memref<1x128xf32, #tpu.memory_space<vmem>>, vector<1x128xf32>
    %4 = vector.broadcast %3 : vector<1x128xf32> to vector<16x128xf32>
    %5 = arith.addf %2, %4 : vector<16x128xf32>
    %cst_5 = arith.constant 0.000000e+00 : f32
    %6 = vector.broadcast %cst_5 : f32 to vector<16x128xf32>
    %7 = arith.maximumf %5, %6 : vector<16x128xf32>
    %c0_6 = arith.constant 0 : index
    %c0_7 = arith.constant 0 : index
    %8 = vector.load %arg4[%c0_6, %c0_7] : memref<128x128xf32, #tpu.memory_space<vmem>>, vector<128x128xf32>
    %cst_8 = arith.constant dense<0.000000e+00> : vector<16x128xf32>
    %9 = tpu.matmul %7, %8, %cst_8 {dimension_numbers = #tpu.dot_dimension_numbers<[1], [0], [0], [1], [0, 0, 1, 1], [], []>} : vector<16x128xf32>, vector<128x128xf32>, vector<16x128xf32> -> vector<16x128xf32>
    %c0_9 = arith.constant 0 : index
    %c0_10 = arith.constant 0 : index
    %10 = vector.load %arg5[%c0_9, %c0_10] : memref<1x128xf32, #tpu.memory_space<vmem>>, vector<1x128xf32>
    %11 = vector.broadcast %10 : vector<1x128xf32> to vector<16x128xf32>
    %12 = arith.addf %9, %11 : vector<16x128xf32>
    %c0_11 = arith.constant 0 : index
    %c0_12 = arith.constant 0 : index
    %13 = vector.load %arg6[%c0_11, %c0_12] : memref<16x128xf32, #tpu.memory_space<vmem>>, vector<16x128xf32>
    tpu.vector_store %arg6[%c0_11, %c0_12], %12 {strides = array<i32>} : memref<16x128xf32, #tpu.memory_space<vmem>>, vector<16x128xf32>,
    return
  }
  func.func @transform_0(%arg0: i32) -> (i32, i32) {
    %c0_i32 = arith.constant 0 : i32
    %c0_i32_0 = arith.constant 0 : i32
    return %arg0, %c0_i32 : i32, i32
  }
  func.func @transform_1(%arg0: i32) -> (i32, i32) {
    %c0_i32 = arith.constant 0 : i32
    %c0_i32_0 = arith.constant 0 : i32
    %c0_i32_1 = arith.constant 0 : i32
    return %c0_i32, %c0_i32_0 : i32, i32
  }
  func.func @transform_2(%arg0: i32) -> (i32, i32) {
    %c0_i32 = arith.constant 0 : i32
    %c0_i32_0 = arith.constant 0 : i32
    %c0_i32_1 = arith.constant 0 : i32
    return %c0_i32, %c0_i32_0 : i32, i32
  }
  func.func @transform_3(%arg0: i32) -> (i32, i32) {
    %c0_i32 = arith.constant 0 : i32
    %c0_i32_0 = arith.constant 0 : i32
    %c0_i32_1 = arith.constant 0 : i32
    return %c0_i32, %c0_i32_0 : i32, i32
  }
  func.func @transform_4(%arg0: i32) -> (i32, i32) {
    %c0_i32 = arith.constant 0 : i32
    %c0_i32_0 = arith.constant 0 : i32
    %c0_i32_1 = arith.constant 0 : i32
    return %c0_i32, %c0_i32_0 : i32, i32
  }
  func.func @transform_5(%arg0: i32) -> (i32, i32) {
    %c0_i32 = arith.constant 0 : i32
    %c0_i32_0 = arith.constant 0 : i32
    return %arg0, %c0_i32 : i32, i32
  }
}

</mosaic_0001>

<bundles_post_ra>
// kernel: simclr_forward.1
= control target key start
LH: loop header
LB: loop body
LE: loop exit
PB: predicated region body
PF: predicated region fallthrough
CT: control target
= control target key end

     0   :  { %vm38_vm0 = vcmask 523264   ;;  %s530_s0 = inlined_call_operand.vmem [shape: f32[16,64], index: 0, kind: input, shape index: {}]   ;;  %s531_s1 = inlined_call_operand.vmem [shape: f32[64,128], index: 1, kind: input, shape index: {}]   ;;  %s532_s2 = inlined_call_operand.vmem [shape: f32[1,128], index: 2, kind: input, shape index: {}]   ;;  %s533_s3 = inlined_call_operand.vmem [shape: f32[128,128], index: 3, kind: input, shape index: {}]   ;;  %s534_s4 = inlined_call_operand.vmem [shape: f32[1,128], index: 4, kind: input, shape index: {}]   ;;  %s535_s5 = inlined_call_operand.hbm [shape: f32[16,128], index: 5, kind: output, shape index: {}]  }
   0x1   :  { %v23_v0 = vld [vmem:[%s531_s1] sm:$0xff]  ;;  %v24_v1 = vld [vmem:[%s531_s1 + $0x8] sm:$0xff]  ;;  %v25_v2 = vld [vmem:[%s531_s1 + $0x10] sm:$0xff] }
   0x2   :  { %v324_v3 = vpack.c.bf16 %v24_v1, %v23_v0  ;;  %v26_v4 = vld [vmem:[%s531_s1 + $0x18] sm:$0xff]  ;;  %v27_v6 = vld [vmem:[%s531_s1 + $0x20] sm:$0xff]  ;;  %v28_v7 = vld [vmem:[%s531_s1 + $0x28] sm:$0xff] }
   0x3   :  { %v328_v5 = vpack.c.bf16 %v26_v4, %v25_v2  ;;  %v21_v8 = vld [vmem:[%s530_s0] sm:$0xff]  ;;  %v123_v10 = vld [vmem:[%s533_s3 + $0x8] sm:$0xff]  ;;  %v124_v12 = vld [vmem:[%s533_s3 + $0x10] sm:$0xff]  ;;  %v332_v14 = vpack.c.bf16 %v28_v7, %v27_v6 }
   0x4   :  { %325 = vmatprep.subr.bf16.mxu0 %v324_v3  ;;  %286 = vmatprep.mubr.msk.f32.mxu0 %vm38_vm0, %v21_v8  ;;  %v122_v9 = vld [vmem:[%s533_s3] sm:$0xff]  ;;  %v125_v13 = vld [vmem:[%s533_s3 + $0x18] sm:$0xff]  ;;  %v127_v17 = vld [vmem:[%s533_s3 + $0x28] sm:$0xff] }
   0x5   :  { %327 = vmatpush3.bf16.msra.mxu0 %v324_v3  ;;  %v340_v11 = vpack.c.bf16 %v123_v10, %v122_v9  ;;  %v344_v15 = vpack.c.bf16 %v125_v13, %v124_v12  ;;  %v126_v16 = vld [vmem:[%s533_s3 + $0x20] sm:$0xff]  ;;  %v29_v18 = vld [vmem:[%s531_s1 + $0x30] sm:$0xff]  ;;  %v30_v19 = vld [vmem:[%s531_s1 + $0x38] sm:$0xff] }
   0x6   :  { %329 = vmatprep.subr.bf16.mxu0 %v328_v5  ;;  %v348_v20 = vpack.c.bf16 %v127_v17, %v126_v16 }
   0x7   :  { %341 = vmatprep.subr.bf16.mxu1 %v340_v11 }
   0x8   :  { %343 = vmatpush3.bf16.msra.mxu1 %v340_v11 }
   0x9   :  { %331 = vmatpush3.bf16.msra.mxu0 %v328_v5  ;;  %345 = vmatprep.subr.bf16.mxu1 %v344_v15 }
   0xa   :  { %10 = vsyncpa [#allocation3], 0  ;;  %333 = vmatprep.subr.bf16.mxu0 %v332_v14  ;;  %v336_v21 = vpack.c.bf16 %v30_v19, %v29_v18  ;;  %v128_v22 = vld [vmem:[%s533_s3 + $0x30] sm:$0xff]  ;;  %v129_v23 = vld [vmem:[%s533_s3 + $0x38] sm:$0xff] }
   0xb   :  { %v352_v24 = vpack.c.bf16 %v129_v23, %v128_v22  ;;  %v130_v25 = vld [vmem:[%s533_s3 + $0x40] sm:$0xff]  ;;  %v131_v26 = vld [vmem:[%s533_s3 + $0x48] sm:$0xff]  ;;  %v132_v29 = vld [vmem:[%s533_s3 + $0x50] sm:$0xff] }
   0xc   :  { %347 = vmatpush3.bf16.msra.mxu1 %v344_v15  ;;  %v22_v27 = vld [vmem:[%s530_s0 + $0x8] sm:$0xff]  ;;  %v356_v28 = vpack.c.bf16 %v131_v26, %v130_v25  ;;  %v133_v30 = vld [vmem:[%s533_s3 + $0x58] sm:$0xff]  ;;  %v134_v32 = vld [vmem:[%s533_s3 + $0x60] sm:$0xff] }
   0xd   :  { %335 = vmatpush3.bf16.msra.mxu0 %v332_v14  ;;  %349 = vmatprep.subr.bf16.mxu1 %v348_v20  ;;  %v360_v31 = vpack.c.bf16 %v133_v30, %v132_v29  ;;  %v135_v33 = vld [vmem:[%s533_s3 + $0x68] sm:$0xff]  ;;  %v136_v35 = vld [vmem:[%s533_s3 + $0x70] sm:$0xff]  ;;  %v137_v36 = vld [vmem:[%s533_s3 + $0x78] sm:$0xff]  ;;  %s399_s3 = smov [#allocation2]  }
   0xe   :  { %337 = vmatprep.subr.bf16.mxu0 %v336_v21  ;;  %v364_v34 = vpack.c.bf16 %v135_v33, %v134_v32  ;;  %v368_v37 = vpack.c.bf16 %v137_v36, %v136_v35  ;;  %v238_v38 = vld [vmem:[%s532_s2] ss:$0 sm:$0xff]  ;;  %s227_s22 = sshll.u32 %s399_s3, 4  ;;  %s228_s22 = int_to_ptr.vmem [resolvable:$true] %s227_s22 }
   0xf   :  { %v241_v45 = vld [vmem:[%s534_s4] ss:$0 sm:$0xff]  ;;  %s375_s2 = scalar_lea.vmem %s228_s22, 256  ;;  %p380_p1 = scmp.lt.s32.totalorder %s228_s22, %s228_s22 }
  0x10   :  { %351 = vmatpush3.bf16.msra.mxu1 %v348_v20  ;;  %p376_p0 = scmp.ne.s32.totalorder %s228_s22, %s375_s2  ;;  %p381_p2 = scmp.lt.s32.totalorder %s375_s2, %s375_s2 }
  0x11   :  { %339 = vmatpush3.bf16.msra.mxu0 %v336_v21  ;;  %353 = vmatprep.subr.bf16.mxu1 %v352_v24 }
  0x12   :  { %p382_p3 = por %p381_p2, %p380_p1 }
  0x14   :  { %287 = vmatmul.mubr.msk.f32.vlgmr.msra.gmra.mrb[0].mxu0 %vm38_vm0, %v22_v27  ;;  %355 = vmatpush3.bf16.msra.mxu1 %v352_v24  ;;  %p383_p4 = pnand %p382_p3, %p376_p0 }
  0x15   :  { %357 = vmatprep.subr.bf16.mxu1 %v356_v28 }
  0x18   :  { %359 = vmatpush3.bf16.msra.mxu1 %v356_v28 }
  0x19   :  { %361 = vmatprep.subr.bf16.mxu1 %v360_v31 }
  0x1c   :  { %363 = vmatpush3.bf16.msra.mxu1 %v360_v31 }
  0x1d   :  { %365 = vmatprep.subr.bf16.mxu1 %v364_v34 }
  0x20   :  { %367 = vmatpush3.bf16.msra.mxu1 %v364_v34 }
  0x21   :  { %369 = vmatprep.subr.bf16.mxu1 %v368_v37 }
  0x24   :  { %371 = vmatpush3.bf16.msra.mxu1 %v368_v37 }
  0xe7   :  { %v288_v39 = vpop.f32.mrb[0].mxu0 }
  0xe8   :  { %v117_v40 = vadd.f32 %v288_v39, %v238_v38  ;;  %v111_v41 = vpop.f32.mrb[1].mxu0 }
  0xe9   :  { %v112_v42 = vadd.f32 %v238_v38, %v111_v41 }
  0xea   :  { %v121_v44 = vmax.f32 %v117_v40, 0.0 }
  0xeb   :  { %v120_v43 = vmax.f32 %v112_v42, 0.0 }
  0xed   :  { %321 = vmatprep.mubr.f32.mxu1 %v120_v43 }
  0xee   :  { %322 = vmatmul.mubr.f32.vlgmr.msra.gmra.mrb[0].mxu1 %v121_v44 }
 0x1c1   :  { %v323_v46 = vpop.f32.mrb[0].mxu1 }
 0x1c2   :  { %v217_v47 = vadd.f32 %v323_v46, %v241_v45  ;;  %v211_v48 = vpop.f32.mrb[1].mxu1 }
 0x1c3   :  { %v212_v49 = vadd.f32 %v241_v45, %v211_v48 }
 0x1c4   :  { %221 = vst [vmem:[#allocation2 + $0x8] sm:$0xff] %v217_v47 }
 0x1c5   :  { %220 = vst [vmem:[#allocation2] sm:$0xff] %v212_v49 }
 0x1c6   :  { %386 = shalt.err (!%p383_p4)
}
 0x1c7   :  { %s387_s4 = scalar_lea.hbm %s535_s5, 256 }
 0x1c8   :  { %p388_p5 = scmp.ne.s32.totalorder %s535_s5, %s387_s4  ;;  %p391_p6 = scmp.lt.u32.totalorder %s387_s4, %s535_s5 }
 0x1ca   :  { %p393_p7 = pnand %p391_p6, %p388_p5 }
 0x1cc   :  { %396 = shalt.err (!%p393_p7)
}
 0x1cd   :  { %s400_s28 = smov 128   ;;  %s401_s29 = smov 8  }
 0x1ce   :  { %233 = dma.vmem_to_hbm [thread:$0]  %s228_s22, 256, %s535_s5, [#allocation3], %s400_s28, %s400_s28, %s401_s29  }
 0x1cf   :  { %397 = dma.done.wait [#allocation3], 256  }
 0x1d0   :  { %398 = vsyncadd [#allocation3], 4294967040 }
 0x1d1   :  { %237 = vsyncpa [#allocation3], 1 }

</bundles_post_ra>
